<compile_context>
chip_gen: v7x
topology: tpu7x:2x2x1
jax: 0.10.0
libtpu: 0.0.40
codegen_flags: <defaults>
</compile_context>

<pallas_src>
import jax
import jax.numpy as jnp
from jax import lax
from jax.experimental import pallas as pl
from jax.experimental.pallas import tpu as pltpu


def _round_up(x, m):
    return ((x + m - 1) // m) * m


def _proj_gram_kernel(x_ref, p_ref, o_ref):
    # out_tile = x_tile @ P, with P = C^T C resident in VMEM.
    o_ref[...] = jnp.dot(
        x_ref[...], p_ref[...], preferred_element_type=jnp.float32
    ).astype(o_ref.dtype)


def _proj_lowrank_kernel(x_ref, ct_ref, c_ref, o_ref):
    # embed = x @ C^T  -> (tm, Rpad): lane-dense because Rpad % 128 == 0 and
    # C^T was pre-transposed in the wrapper (no per-step XLU transpose).
    embed = jnp.dot(x_ref[...], ct_ref[...], preferred_element_type=jnp.float32)
    out = jnp.dot(embed, c_ref[...], preferred_element_type=jnp.float32)
    o_ref[...] = out.astype(o_ref.dtype)


def _tpu_generation():
    """Returns (tensorcores_per_chip, vmem_budget_bytes, vmem_limit_bytes)."""
    try:
        kind = jax.devices()[0].device_kind.lower()
    except Exception:
        kind = ""
    if "v7" in kind:
        # 2 TCs / chip, 64 MiB VMEM per TC: leave headroom for Mosaic scratch.
        return 2, 32 << 20, 48 << 20
    # v5e / v6e: 1 TC per chip, 128 MiB VMEM.
    return 1, 64 << 20, 96 << 20


def _choose_tm(n, d, weight_bytes, num_tc, budget):
    """Largest row tile whose double-buffered x/out tiles (+ resident weights)
    fit the VMEM budget; require >=2 grid steps per TensorCore only on
    multi-TC chips; then re-balance to a multiple of 8 that minimizes wasted
    rows in the last (partial) block."""
    tm = 8
    for cand in (2048, 1024, 512, 256, 128, 64, 32, 16, 8):
        need = 2 * 2 * cand * d * 4 + 2 * weight_bytes  # x + out, 2 bufs, f32
        if need <= budget:
            tm = cand
            break
    # Pipelining: only multi-TC chips need several steps (>=2 per core); on
    # single-TC v5e/v6e one big step beats extra per-step overhead.
    min_steps = 2 * num_tc if num_tc >= 2 else 1
    while tm > 8 and pl.cdiv(n, tm) < min_steps:
        tm //= 2
    # Never allocate a tile (much) bigger than the problem.
    tm = min(tm, _round_up(n, 8))
    # Re-balance: keep the same block count, shrink the tile to the smallest
    # multiple of 8 that still covers N (bounds last-block waste).
    n_blocks = pl.cdiv(n, tm)
    tm = max(8, min(tm, _round_up(pl.cdiv(n, n_blocks), 8)))
    return tm


class SVDProjector:
    """Pallas TPU port of TorchSVDProjector: __call__(x) = (x @ C.T) @ C.

    Weight preprocessing (Gram matrix or padded transpose) happens once here,
    mirroring the PyTorch module's register_buffer at __init__ (hoisted out of
    the per-call path, as the review asked).
    """

    def __init__(self, components, precompute_gram=None):
        components = jnp.asarray(components, jnp.float32)
        self.components = components
        R, D = components.shape
        self.R, self.D = R, D
        rpad = max(128, _round_up(R, 128))  # lane-dense embed width
        if precompute_gram is None:
            # Gram flops/row: 2*D*D ; low-rank flops/row: 4*D*rpad.
            precompute_gram = D <= 2 * rpad
        self.precompute_gram = bool(precompute_gram)
        if self.precompute_gram:
            # NOTE: x @ (C^T C) squares the conditioning of C; fine for the
            # (near-)orthonormal SVD bases this module is used with.
            self.gram = jnp.dot(components.T, components,
                                precision=lax.Precision.HIGHEST)
            self.weights = (self.gram,)
            self.kernel = _proj_gram_kernel
            self.flops_per_row = 2 * D * D
        else:
            c_pad = jnp.zeros((rpad, D), jnp.float32).at[:R].set(components)
            self.c_pad = c_pad              # (Rpad, D), rows >= R are zero
            self.c_t = c_pad.T              # (D, Rpad), materialized once
            self.weights = (self.c_t, self.c_pad)
            self.kernel = _proj_lowrank_kernel
            self.flops_per_row = 4 * D * rpad
        self.weight_bytes = sum(int(w.size) * 4 for w in self.weights)
        self.num_tc, self.vmem_budget, self.vmem_limit = _tpu_generation()

    def __call__(self, x, in_place=False):
        N, D = x.shape
        assert D == self.D, "feature dims must match"
        tm = _choose_tm(N, D, self.weight_bytes, self.num_tc, self.vmem_budget)
        grid = (pl.cdiv(N, tm),)

        in_specs = [pl.BlockSpec((tm, D), lambda i: (i, 0))]   # x row tile
        in_specs += [pl.BlockSpec(w.shape, lambda i: (0, 0))   # resident weights
                     for w in self.weights]
        # TODO(synk): single-buffer the invariant weight specs
        # (pipeline_mode=pl.Buffered(1)) once that is safe on all toolchains;
        # the VMEM budget above conservatively counts two buffers.

        # PyTorch `out=x` semantics: alias the output HBM buffer onto x.
        aliases = {0: 0} if in_place else {}

        return pl.pallas_call(
            self.kernel,
            out_shape=jax.ShapeDtypeStruct((N, D), x.dtype),
            grid_spec=pltpu.PrefetchScalarGridSpec(
                num_scalar_prefetch=0,
                grid=grid,
                in_specs=in_specs,
                out_specs=pl.BlockSpec((tm, D), lambda i: (i, 0)),
            ),
            compiler_params=pltpu.CompilerParams(
                dimension_semantics=("parallel",),
                vmem_limit_bytes=self.vmem_limit,
            ),
            cost_estimate=pl.CostEstimate(
                flops=self.flops_per_row * N,
                transcendentals=0,
                bytes_accessed=2 * N * D * 4 + self.weight_bytes,
            ),
            input_output_aliases=aliases,
        )(x, *self.weights)


def svd_projector(x, components, *, in_place=False, precompute_gram=None):
    """One-shot convenience wrapper (builds the projector per call)."""
    return SVDProjector(components, precompute_gram)(x, in_place=in_place)


if __name__ == "__main__":
    key = jax.random.PRNGKey(0)
    kx, kc, kx2, kc2 = jax.random.split(key, 4)

    def ref_proj(x, c):
        return jnp.matmul(
            jnp.matmul(x, c.T, precision=lax.Precision.HIGHEST),
            c, precision=lax.Precision.HIGHEST)

    # Low-rank path (D > 2*Rpad): N intentionally not tile-aligned to
    # exercise the masked partial boundary block (no wrapper padding).
    N, D, R = 200, 384, 8
    x = jax.random.normal(kx, (N, D), dtype=jnp.float32)
    comps = jax.random.normal(kc, (R, D), dtype=jnp.float32)
    proj = SVDProjector(comps)
    assert not proj.precompute_gram
    out = jax.block_until_ready(proj(x))
    assert out.shape == (N, D) and out.dtype == jnp.float32
    assert jnp.allclose(out, ref_proj(x, comps), atol=2e-3, rtol=2e-3)

    # in_place (PyTorch out=x) path via input_output_aliases, non-aligned N.
    out_ip = jax.block_until_ready(proj(x, in_place=True))
    assert jnp.allclose(out_ip, ref_proj(x, comps), atol=2e-3, rtol=2e-3)

    # Gram path: small D where x @ (C^T C) is the cheaper single matmul.
    N2, D2, R2 = 256, 128, 8
    x2 = jax.random.normal(kx2, (N2, D2), dtype=jnp.float32)
    comps2 = jax.random.normal(kc2, (R2, D2), dtype=jnp.float32)
    proj2 = SVDProjector(comps2)
    assert proj2.precompute_gram
    out2 = jax.block_until_ready(proj2(x2))
    assert jnp.allclose(out2, ref_proj(x2, comps2), atol=2e-3, rtol=2e-3)

    # Explicit override: Gram path on the larger-D problem still matches.
    out3 = jax.block_until_ready(svd_projector(x, comps, precompute_gram=True))
    assert jnp.allclose(out3, ref_proj(x, comps), atol=2e-3, rtol=2e-3)

    print("KERNEL_OK")
</pallas_src>

<mosaic_0001>
module attributes {stable_mosaic.version = 11 : i64} {
  func.func @_proj_lowrank_kernel(%arg0: i32, %arg1: memref<200x384xf32, #tpu.memory_space<vmem>>, %arg2: memref<384x128xf32, #tpu.memory_space<vmem>>, %arg3: memref<128x384xf32, #tpu.memory_space<vmem>>, %arg4: memref<200x384xf32, #tpu.memory_space<vmem>>) attributes {dimension_semantics = [#tpu.dimension_semantics<parallel>], iteration_bounds = array<i64: 1>, scalar_prefetch = 0 : i64, scratch_operands = 0 : i64, tpu.core_type = #tpu.core_type<tc>, window_params = [{transform_indices = @transform_0, window_bounds = array<i64: 200, 384>}, {pipeline_mode = #tpu.pipeline_mode<synchronous>, transform_indices = @transform_1, window_bounds = array<i64: 384, 128>}, {pipeline_mode = #tpu.pipeline_mode<synchronous>, transform_indices = @transform_2, window_bounds = array<i64: 128, 384>}, {transform_indices = @transform_3, window_bounds = array<i64: 200, 384>}]} {
    %c0 = arith.constant 0 : index
    %c0_0 = arith.constant 0 : index
    %0 = vector.load %arg1[%c0, %c0_0] : memref<200x384xf32, #tpu.memory_space<vmem>>, vector<200x384xf32>
    %c0_1 = arith.constant 0 : index
    %c0_2 = arith.constant 0 : index
    %1 = vector.load %arg2[%c0_1, %c0_2] : memref<384x128xf32, #tpu.memory_space<vmem>>, vector<384x128xf32>
    %cst = arith.constant dense<0.000000e+00> : vector<200x128xf32>
    %2 = tpu.matmul %0, %1, %cst {dimension_numbers = #tpu.dot_dimension_numbers<[1], [0], [0], [1], [0, 0, 1, 1], [], []>} : vector<200x384xf32>, vector<384x128xf32>, vector<200x128xf32> -> vector<200x128xf32>
    %c0_3 = arith.constant 0 : index
    %c0_4 = arith.constant 0 : index
    %3 = vector.load %arg3[%c0_3, %c0_4] : memref<128x384xf32, #tpu.memory_space<vmem>>, vector<128x384xf32>
    %cst_5 = arith.constant dense<0.000000e+00> : vector<200x384xf32>
    %4 = tpu.matmul %2, %3, %cst_5 {dimension_numbers = #tpu.dot_dimension_numbers<[1], [0], [0], [1], [0, 0, 1, 1], [], []>} : vector<200x128xf32>, vector<128x384xf32>, vector<200x384xf32> -> vector<200x384xf32>
    %c0_6 = arith.constant 0 : index
    %c0_7 = arith.constant 0 : index
    %5 = vector.load %arg4[%c0_6, %c0_7] : memref<200x384xf32, #tpu.memory_space<vmem>>, vector<200x384xf32>
    tpu.vector_store %arg4[%c0_6, %c0_7], %4 {strides = array<i32>} : memref<200x384xf32, #tpu.memory_space<vmem>>, vector<200x384xf32>,
    return
  }
  func.func @transform_0(%arg0: i32) -> (i32, i32) {
    %c0_i32 = arith.constant 0 : i32
    %c0_i32_0 = arith.constant 0 : i32
    return %arg0, %c0_i32 : i32, i32
  }
  func.func @transform_1(%arg0: i32) -> (i32, i32) {
    %c0_i32 = arith.constant 0 : i32
    %c0_i32_0 = arith.constant 0 : i32
    %c0_i32_1 = arith.constant 0 : i32
    return %c0_i32, %c0_i32_0 : i32, i32
  }
  func.func @transform_2(%arg0: i32) -> (i32, i32) {
    %c0_i32 = arith.constant 0 : i32
    %c0_i32_0 = arith.constant 0 : i32
    %c0_i32_1 = arith.constant 0 : i32
    return %c0_i32, %c0_i32_0 : i32, i32
  }
  func.func @transform_3(%arg0: i32) -> (i32, i32) {
    %c0_i32 = arith.constant 0 : i32
    %c0_i32_0 = arith.constant 0 : i32
    return %arg0, %c0_i32 : i32, i32
  }
}

</mosaic_0001>

<bundles_post_ra>
// kernel: tpu_custom_call.1
= control target key start
LH: loop header
LB: loop body
LE: loop exit
PB: predicated region body
PF: predicated region fallthrough
CT: control target
= control target key end

     0   :  { %8 = vsyncpa [#allocation3], 0  ;;  %s2005_s0 = inlined_call_operand.hbm [shape: f32[200,384], index: 0, kind: input, shape index: {}]   ;;  %s2006_s1 = inlined_call_operand.hbm [shape: f32[384,128], index: 1, kind: input, shape index: {}]   ;;  %s2007_s2 = inlined_call_operand.hbm [shape: f32[128,384], index: 2, kind: input, shape index: {}]   ;;  %s2008_s3 = inlined_call_operand.hbm [shape: f32[200,384], index: 3, kind: output, shape index: {}]  }
   0x1   :  { %9 = vsyncpa [#allocation6], 0 }
   0x2   :  { %10 = vsyncpa [#allocation4], 0  ;;  %s1684_s12 = smov [#allocation5]   ;;  %s1590_s16 = scalar_lea.hbm %s2006_s1, 6144 }
   0x3   :  { %s28_s13 = sshll.u32 %s1684_s12, 4  ;;  %p1591_p0 = scmp.ne.s32.totalorder %s2006_s1, %s1590_s16  ;;  %s29_s13 = int_to_ptr.vmem [resolvable:$true] %s28_s13 }
   0x4   :  { %p1594_p1 = scmp.lt.u32.totalorder %s1590_s16, %s2006_s1 }
   0x6   :  { %p1596_p2 = pnand %p1594_p1, %p1591_p0 }
   0x8   :  { %1599 = shalt.err (!%p1596_p2)
}
   0x9   :  { %s1600_s21 = scalar_lea.vmem %s29_s13, 6144  ;;  %p1605_p4 = scmp.lt.s32.totalorder %s29_s13, %s29_s13 }
   0xa   :  { %p1601_p3 = scmp.ne.s32.totalorder %s29_s13, %s1600_s21  ;;  %p1606_p5 = scmp.lt.s32.totalorder %s1600_s21, %s1600_s21 }
   0xc   :  { %p1607_p6 = por %p1606_p5, %p1605_p4 }
   0xe   :  { %p1608_p7 = pnand %p1607_p6, %p1601_p3 }
  0x10   :  { %1611 = shalt.err (!%p1608_p7)
}
  0x11   :  { %s1685_s22 = smov 128   ;;  %s1686_s23 = smov 8  }
  0x12   :  { %34 = dma.hbm_to_vmem [thread:$0]  %s2006_s1, 6144, %s29_s13, [#allocation6], %s1685_s22, %s1685_s22, %s1686_s23  }
  0x13   :  { %s1687_s26 = smov [#allocation2]   ;;  %s1612_s30 = scalar_lea.hbm %s2005_s0, 9600 }
  0x14   :  { %s16_s27 = sshll.u32 %s1687_s26, 4  ;;  %p1613_p8 = scmp.ne.s32.totalorder %s2005_s0, %s1612_s30  ;;  %s17_s27 = int_to_ptr.vmem [resolvable:$true] %s16_s27 }
  0x15   :  { %p1616_p9 = scmp.lt.u32.totalorder %s1612_s30, %s2005_s0 }
  0x17   :  { %p1618_p10 = pnand %p1616_p9, %p1613_p8 }
  0x19   :  { %1621 = shalt.err (!%p1618_p10)
}
  0x1a   :  { %s1622_s8 = scalar_lea.vmem %s17_s27, 9600  ;;  %p1627_p12 = scmp.lt.s32.totalorder %s17_s27, %s17_s27 }
  0x1b   :  { %p1623_p11 = scmp.ne.s32.totalorder %s17_s27, %s1622_s8  ;;  %p1628_p13 = scmp.lt.s32.totalorder %s1622_s8, %s1622_s8 }
  0x1d   :  { %p1629_p0 = por %p1628_p13, %p1627_p12 }
  0x1f   :  { %p1630_p1 = pnand %p1629_p0, %p1623_p11 }
  0x21   :  { %1633 = shalt.err (!%p1630_p1)
}
  0x22   :  { %s1688_s1 = smov 384   ;;  %s1689_s9 = smov 24  }
  0x23   :  { %22 = dma.hbm_to_vmem [thread:$0]  %s2005_s0, 9600, %s17_s27, [#allocation3], %s1688_s1, %s1688_s1, %s1689_s9  }
  0x24   :  { %s1690_s12 = smov [#allocation7]   ;;  %s1634_s16 = scalar_lea.hbm %s2007_s2, 6144 }
  0x25   :  { %s40_s13 = sshll.u32 %s1690_s12, 4  ;;  %p1635_p2 = scmp.ne.s32.totalorder %s2007_s2, %s1634_s16  ;;  %s41_s13 = int_to_ptr.vmem [resolvable:$true] %s40_s13 }
  0x26   :  { %p1638_p3 = scmp.lt.u32.totalorder %s1634_s16, %s2007_s2 }
  0x28   :  { %p1640_p4 = pnand %p1638_p3, %p1635_p2 }
  0x2a   :  { %1643 = shalt.err (!%p1640_p4)
}
  0x2b   :  { %s1644_s21 = scalar_lea.vmem %s41_s13, 6144  ;;  %p1649_p6 = scmp.lt.s32.totalorder %s41_s13, %s41_s13 }
  0x2c   :  { %p1645_p5 = scmp.ne.s32.totalorder %s41_s13, %s1644_s21  ;;  %p1650_p7 = scmp.lt.s32.totalorder %s1644_s21, %s1644_s21 }
  0x2e   :  { %p1651_p8 = por %p1650_p7, %p1649_p6 }
  0x30   :  { %p1652_p9 = pnand %p1651_p8, %p1645_p5 }
  0x32   :  { %1655 = shalt.err (!%p1652_p9)
}
  0x33   :  { %46 = dma.hbm_to_vmem [thread:$0]  %s2007_s2, 6144, %s41_s13, [#allocation6], %s1688_s1, %s1688_s1, %s1689_s9  }
  0x34   :  { %1678 = dma.done.wait [#allocation3], 9600  }
  0x35   :  { %1679 = vsyncadd [#allocation3], 4294957696 }
  0x36   :  { %1680 = dma.done.wait [#allocation6], 12288  }
  0x37   :  { %1681 = vsyncadd [#allocation6], 4294955008  ;;  %v1691_v0 = vmov 0.0|0.0   ;;  %v131_v1 = vld [vmem:[#allocation5] sm:$0xff]  ;;  %v132_v2 = vld [vmem:[#allocation5 + $0x8] sm:$0xff]  ;;  %v1692_v32 = vmov 0.0  }
  0x38   :  { %1401 = vmatprep.subr.bf16.mxu0 %v1691_v0  ;;  %v133_v3 = vld [vmem:[#allocation5 + $0x10] sm:$0xff]  ;;  %v1402_v4 = vpack.c.bf16 %v132_v2, %v131_v1  ;;  %v134_v5 = vld [vmem:[#allocation5 + $0x18] sm:$0xff]  ;;  %v135_v7 = vld [vmem:[#allocation5 + $0x20] sm:$0xff]  ;;  %671 = vmatprep.mubr.f32.mxu1 %v1692_v32  ;;  %vm1693_vm0 = vmmov 0   ;;  %s1694_s2 = smov [#allocation8]  }
  0x39   :  { %v1405_v6 = vpack.c.bf16 %v134_v5, %v133_v3  ;;  %v136_v8 = vld [vmem:[#allocation5 + $0x28] sm:$0xff]  ;;  %v137_v10 = vld [vmem:[#allocation5 + $0x30] sm:$0xff]  ;;  %v138_v11 = vld [vmem:[#allocation5 + $0x38] sm:$0xff]  ;;  %s1092_s23 = sshll.u32 %s1694_s2, 4  ;;  %s1093_s23 = int_to_ptr.vmem [resolvable:$true] %s1092_s23 }
  0x3a   :  { %1403 = vmatpush1.bf16.msra.mxu0 %v1402_v4  ;;  %v1408_v9 = vpack.c.bf16 %v136_v8, %v135_v7  ;;  %v57_v12 = vld [vmem:[#allocation2 + $0x8] sm:$0xff]  ;;  %v1411_v13 = vpack.c.bf16 %v138_v11, %v137_v10  ;;  %v139_v14 = vld [vmem:[#allocation5 + $0x40] sm:$0xff]  ;;  %v140_v15 = vld [vmem:[#allocation5 + $0x48] sm:$0xff]  ;;  %s1656_s24 = scalar_lea.vmem %s1093_s23, 9600  ;;  %p1661_p11 = scmp.lt.s32.totalorder %s1093_s23, %s1093_s23 }
  0x3b   :  { %1404 = vmatprep.subr.bf16.mxu0 %v1691_v0  ;;  %243 = vmatprep.mubr.f32.mxu0 %v57_v12  ;;  %v1414_v16 = vpack.c.bf16 %v140_v15, %v139_v14  ;;  %v141_v17 = vld [vmem:[#allocation5 + $0x50] sm:$0xff]  ;;  %v142_v18 = vld [vmem:[#allocation5 + $0x58] sm:$0xff]  ;;  %v143_v20 = vld [vmem:[#allocation5 + $0x60] sm:$0xff]  ;;  %p1657_p10 = scmp.ne.s32.totalorder %s1093_s23, %s1656_s24  ;;  %p1662_p12 = scmp.lt.s32.totalorder %s1656_s24, %s1656_s24 }
  0x3c   :  { %v1417_v19 = vpack.c.bf16 %v142_v18, %v141_v17  ;;  %v144_v21 = vld [vmem:[#allocation5 + $0x68] sm:$0xff]  ;;  %v145_v23 = vld [vmem:[#allocation5 + $0x70] sm:$0xff]  ;;  %v146_v24 = vld [vmem:[#allocation5 + $0x78] sm:$0xff] }
  0x3d   :  { %v1420_v22 = vpack.c.bf16 %v144_v21, %v143_v20  ;;  %v1423_v25 = vpack.c.bf16 %v146_v24, %v145_v23  ;;  %v147_v26 = vld [vmem:[#allocation5 + $0x80] sm:$0xff]  ;;  %v148_v27 = vld [vmem:[#allocation5 + $0x88] sm:$0xff]  ;;  %v149_v29 = vld [vmem:[#allocation5 + $0x90] sm:$0xff]  ;;  %p1663_p13 = por %p1662_p12, %p1661_p11 }
  0x3e   :  { %1406 = vmatpush1.bf16.msra.mxu0 %v1405_v6  ;;  %v1426_v28 = vpack.c.bf16 %v148_v27, %v147_v26  ;;  %v150_v30 = vld [vmem:[#allocation5 + $0x98] sm:$0xff]  ;;  %v151_v33 = vld [vmem:[#allocation5 + $0xa0] sm:$0xff]  ;;  %v152_v34 = vld [vmem:[#allocation5 + $0xa8] sm:$0xff] }
  0x3f   :  { %1407 = vmatprep.subr.bf16.mxu0 %v1691_v0  ;;  %v1429_v31 = vpack.c.bf16 %v150_v30, %v149_v29  ;;  %v1432_v35 = vpack.c.bf16 %v152_v34, %v151_v33  ;;  %v153_v36 = vld [vmem:[#allocation5 + $0xb0] sm:$0xff]  ;;  %v154_v37 = vld [vmem:[#allocation5 + $0xb8] sm:$0xff]  ;;  %v155_v39 = vld [vmem:[#allocation5 + $0xc0] sm:$0xff]  ;;  %p1664_p0 = pnand %p1663_p13, %p1657_p10 }
  0x40   :  { %v1435_v38 = vpack.c.bf16 %v154_v37, %v153_v36  ;;  %v156_v40 = vld [vmem:[#allocation5 + $0xc8] sm:$0xff]  ;;  %v157_v42 = vld [vmem:[#allocation5 + $0xd0] sm:$0xff]  ;;  %v158_v43 = vld [vmem:[#allocation5 + $0xd8] sm:$0xff] }
  0x41   :  { %v1438_v41 = vpack.c.bf16 %v156_v40, %v155_v39  ;;  %v1441_v44 = vpack.c.bf16 %v158_v43, %v157_v42  ;;  %v159_v45 = vld [vmem:[#allocation5 + $0xe0] sm:$0xff]  ;;  %v160_v46 = vld [vmem:[#allocation5 + $0xe8] sm:$0xff]  ;;  %v161_v48 = vld [vmem:[#allocation5 + $0xf0] sm:$0xff] }
  0x42   :  { %1409 = vmatpush1.bf16.msra.mxu0 %v1408_v9  ;;  %v1444_v47 = vpack.c.bf16 %v160_v46, %v159_v45  ;;  %v162_v49 = vld [vmem:[#allocation5 + $0xf8] sm:$0xff]  ;;  %v163_v51 = vld [vmem:[#allocation5 + $0x100] sm:$0xff]  ;;  %v164_v52 = vld [vmem:[#allocation5 + $0x108] sm:$0xff] }
  0x43   :  { %1410 = vmatprep.subr.bf16.mxu0 %v1691_v0  ;;  %v1447_v50 = vpack.c.bf16 %v162_v49, %v161_v48  ;;  %v56_v53 = vld [vmem:[#allocation2] sm:$0xff]  ;;  %v1450_v54 = vpack.c.bf16 %v164_v52, %v163_v51  ;;  %v165_v56 = vld [vmem:[#allocation5 + $0x110] sm:$0xff]  ;;  %v166_v57 = vld [vmem:[#allocation5 + $0x118] sm:$0xff] }
  0x44   :  { %v60_v55 = vld [vmem:[#allocation2 + $0x20] sm:$0xff]  ;;  %v59_v58 = vld [vmem:[#allocation2 + $0x18] sm:$0xff]  ;;  %v1453_v59 = vpack.c.bf16 %v166_v57, %v165_v56  ;;  %v62_v63 = vld [vmem:[#allocation2 + $0x30] sm:$0xff] }
  0x45   :  { %v63_v60 = vld [vmem:[#allocation2 + $0x38] sm:$0xff]  ;;  %v168_v62 = vld [vmem:[#allocation5 + $0x128] sm:$0xff]  ;;  %v66_v2 = vld [vmem:[#allocation2 + $0x50] sm:$0xff] }
  0x46   :  { %1412 = vmatpush1.bf16.msra.mxu0 %v1411_v13  ;;  %v167_v61 = vld [vmem:[#allocation5 + $0x120] sm:$0xff]  ;;  %v169_v3 = vld [vmem:[#allocation5 + $0x130] sm:$0xff]  ;;  %v170_v4 = vld [vmem:[#allocation5 + $0x138] sm:$0xff] }
  0x47   :  { %1413 = vmatprep.subr.bf16.mxu0 %v1691_v0  ;;  %v1456_v1 = vpack.c.bf16 %v168_v62, %v167_v61  ;;  %v65_v5 = vld [vmem:[#allocation2 + $0x48] sm:$0xff]  ;;  %v1459_v6 = vpack.c.bf16 %v170_v4, %v169_v3  ;;  %v171_v8 = vld [vmem:[#allocation5 + $0x140] sm:$0xff]  ;;  %v172_v9 = vld [vmem:[#allocation5 + $0x148] sm:$0xff] }
  0x48   :  { %v69_v7 = vld [vmem:[#allocation2 + $0x68] sm:$0xff]  ;;  %v68_v10 = vld [vmem:[#allocation2 + $0x60] sm:$0xff]  ;;  %v1462_v11 = vpack.c.bf16 %v172_v9, %v171_v8  ;;  %v174_v14 = vld [vmem:[#allocation5 + $0x158] sm:$0xff] }
  0x49   :  { %v72_v12 = vld [vmem:[#allocation2 + $0x80] sm:$0xff]  ;;  %v173_v13 = vld [vmem:[#allocation5 + $0x150] sm:$0xff]  ;;  %v71_v15 = vld [vmem:[#allocation2 + $0x78] sm:$0xff] }
  0x4a   :  { %1415 = vmatpush1.bf16.msra.mxu0 %v1414_v16  ;;  %v1465_v16 = vpack.c.bf16 %v174_v14, %v173_v13  ;;  %v75_v17 = vld [vmem:[#allocation2 + $0x98] sm:$0xff]  ;;  %v74_v20 = vld [vmem:[#allocation2 + $0x90] sm:$0xff]  ;;  %v177_v23 = vld [vmem:[#allocation5 + $0x170] sm:$0xff] }
  0x4b   :  { %1416 = vmatprep.subr.bf16.mxu0 %v1691_v0  ;;  %v175_v18 = vld [vmem:[#allocation5 + $0x160] sm:$0xff]  ;;  %v178_v24 = vld [vmem:[#allocation5 + $0x178] sm:$0xff]  ;;  %v81_v27 = vld [vmem:[#allocation2 + $0xc8] sm:$0xff] }
  0x4c   :  { %v1471_v26 = vpack.c.bf16 %v178_v24, %v177_v23  ;;  %v84_v29 = vld [vmem:[#allocation2 + $0xe0] sm:$0xff]  ;;  %v83_v30 = vld [vmem:[#allocation2 + $0xd8] sm:$0xff]  ;;  %v86_v33 = vld [vmem:[#allocation2 + $0xf0] sm:$0xff] }
  0x4d   :  { %v90_v34 = vld [vmem:[#allocation2 + $0x110] sm:$0xff]  ;;  %v93_v36 = vld [vmem:[#allocation2 + $0x128] sm:$0xff]  ;;  %v92_v37 = vld [vmem:[#allocation2 + $0x120] sm:$0xff] }
  0x4e   :  { %1418 = vmatpush1.bf16.msra.mxu0 %v1417_v19  ;;  %v176_v19 = vld [vmem:[#allocation5 + $0x168] sm:$0xff]  ;;  %v95_v39 = vld [vmem:[#allocation2 + $0x138] sm:$0xff]  ;;  %v102_v42 = vld [vmem:[#allocation2 + $0x170] sm:$0xff] }
  0x4f   :  { %1419 = vmatprep.subr.bf16.mxu0 %v1691_v0  ;;  %v1468_v21 = vpack.c.bf16 %v176_v19, %v175_v18  ;;  %v99_v40 = vld [vmem:[#allocation2 + $0x158] sm:$0xff]  ;;  %v101_v43 = vld [vmem:[#allocation2 + $0x168] sm:$0xff]  ;;  %v104_v45 = vld [vmem:[#allocation2 + $0x180] sm:$0xff] }
  0x50   :  { %v108_v46 = vld [vmem:[#allocation2 + $0x1a0] sm:$0xff]  ;;  %v111_v48 = vld [vmem:[#allocation2 + $0x1b8] sm:$0xff]  ;;  %v110_v49 = vld [vmem:[#allocation2 + $0x1b0] sm:$0xff] }
  0x51   :  { %v560_v51 = vld [vmem:[#allocation7 + $0x8] sm:$0xff]  ;;  %v563_v52 = vld [vmem:[#allocation7 + $0x20] sm:$0xff]  ;;  %v566_v56 = vld [vmem:[#allocation7 + $0x38] sm:$0xff] }
  0x52   :  { %1421 = vmatpush1.bf16.msra.mxu0 %v1420_v22  ;;  %v78_v22 = vld [vmem:[#allocation2 + $0xb0] sm:$0xff]  ;;  %v569_v57 = vld [vmem:[#allocation7 + $0x50] sm:$0xff]  ;;  %v568_v61 = vld [vmem:[#allocation7 + $0x48] sm:$0xff] }
  0x53   :  { %1422 = vmatprep.subr.bf16.mxu0 %v1691_v0  ;;  %v572_v62 = vld [vmem:[#allocation7 + $0x68] sm:$0xff]  ;;  %v571_v4 = vld [vmem:[#allocation7 + $0x60] sm:$0xff]  ;;  %v581_v8 = vld [vmem:[#allocation7 + $0xb0] sm:$0xff] }
  0x54   :  { %v580_v13 = vld [vmem:[#allocation7 + $0xa8] sm:$0xff]  ;;  %v119_v18 = vld [vmem:[#allocation2 + $0x1f8] sm:$0xff]  ;;  %v590_v23 = vld [vmem:[#allocation7 + $0xf8] sm:$0xff] }
  0x55   :  { %v120_v14 = vld [vmem:[#allocation2 + $0x200] sm:$0xff]  ;;  %v593_v24 = vld [vmem:[#allocation7 + $0x110] sm:$0xff] }
  0x56   :  { %1424 = vmatpush1.bf16.msra.mxu0 %v1423_v25  ;;  %v77_v25 = vld [vmem:[#allocation2 + $0xa8] sm:$0xff] }
  0x57   :  { %1425 = vmatprep.subr.bf16.mxu0 %v1691_v0 }
  0x5a   :  { %1427 = vmatpush1.bf16.msra.mxu0 %v1426_v28  ;;  %v80_v28 = vld [vmem:[#allocation2 + $0xc0] sm:$0xff] }
  0x5b   :  { %1428 = vmatprep.subr.bf16.mxu0 %v1691_v0 }
  0x5e   :  { %1430 = vmatpush1.bf16.msra.mxu0 %v1429_v31  ;;  %v87_v31 = vld [vmem:[#allocation2 + $0xf8] sm:$0xff] }
  0x5f   :  { %1431 = vmatprep.subr.bf16.mxu0 %v1691_v0 }
  0x62   :  { %1433 = vmatpush1.bf16.msra.mxu0 %v1432_v35  ;;  %v89_v35 = vld [vmem:[#allocation2 + $0x108] sm:$0xff] }
  0x63   :  { %1434 = vmatprep.subr.bf16.mxu0 %v1691_v0 }
  0x66   :  { %1436 = vmatpush1.bf16.msra.mxu0 %v1435_v38  ;;  %v96_v38 = vld [vmem:[#allocation2 + $0x140] sm:$0xff] }
  0x67   :  { %1437 = vmatprep.subr.bf16.mxu0 %v1691_v0 }
  0x6a   :  { %1439 = vmatpush1.bf16.msra.mxu0 %v1438_v41  ;;  %v98_v41 = vld [vmem:[#allocation2 + $0x150] sm:$0xff] }
  0x6b   :  { %1440 = vmatprep.subr.bf16.mxu0 %v1691_v0 }
  0x6e   :  { %1442 = vmatpush1.bf16.msra.mxu0 %v1441_v44  ;;  %v105_v44 = vld [vmem:[#allocation2 + $0x188] sm:$0xff] }
  0x6f   :  { %1443 = vmatprep.subr.bf16.mxu0 %v1691_v0 }
  0x72   :  { %1445 = vmatpush1.bf16.msra.mxu0 %v1444_v47  ;;  %v107_v47 = vld [vmem:[#allocation2 + $0x198] sm:$0xff] }
  0x73   :  { %1446 = vmatprep.subr.bf16.mxu0 %v1691_v0 }
  0x76   :  { %1448 = vmatpush1.bf16.msra.mxu0 %v1447_v50  ;;  %v114_v50 = vld [vmem:[#allocation2 + $0x1d0] sm:$0xff] }
  0x77   :  { %1449 = vmatprep.subr.bf16.mxu0 %v1691_v0 }
  0x79   :  { %244 = vmatmul.mubr.f32.vlgmr.msra.gmra.mrb[0].mxu0 %v56_v53  ;;  %v559_v53 = vld [vmem:[#allocation7] sm:$0xff] }
  0x7a   :  { %1451 = vmatpush3.bf16.msra.mxu0 %v1450_v54  ;;  %248 = vmatprep.mubr.f32.mxu0 %v60_v55  ;;  %v1473_v54 = vpack.c.bf16 %v563_v52, %v560_v51  ;;  %v562_v55 = vld [vmem:[#allocation7 + $0x18] sm:$0xff]  ;;  %v67_v51 = vld [vmem:[#allocation2 + $0x58] sm:$0xff] }
  0x7b   :  { %1452 = vmatprep.subr.bf16.mxu0 %v1691_v0  ;;  %v70_v52 = vld [vmem:[#allocation2 + $0x70] sm:$0xff] }
  0x7c   :  { %1474 = vmatprep.subr.bf16.mxu1 %v1473_v54  ;;  %v76_v54 = vld [vmem:[#allocation2 + $0xa0] sm:$0xff] }
  0x7d   :  { %249 = vmatmul.mubr.f32.gmra.mrb[2].mxu0 %v59_v58  ;;  %v1475_v58 = vpack.c.bf16 %v562_v55, %v559_v53  ;;  %v73_v53 = vld [vmem:[#allocation2 + $0x88] sm:$0xff]  ;;  %v79_v55 = vld [vmem:[#allocation2 + $0xb8] sm:$0xff] }
  0x7e   :  { %253 = vmatprep.mubr.f32.mxu0 %v63_v60  ;;  %1454 = vmatpush3.bf16.msra.mxu0 %v1453_v59  ;;  %v1477_v59 = vpack.c.bf16 %v569_v57, %v566_v56  ;;  %v565_v60 = vld [vmem:[#allocation7 + $0x30] sm:$0xff]  ;;  %v82_v56 = vld [vmem:[#allocation2 + $0xd0] sm:$0xff] }
  0x7f   :  { %1455 = vmatprep.subr.bf16.mxu0 %v1691_v0  ;;  %1476 = vmatpush1.bf16.msra.mxu1 %v1475_v58  ;;  %v85_v57 = vld [vmem:[#allocation2 + $0xe8] sm:$0xff]  ;;  %v88_v58 = vld [vmem:[#allocation2 + $0x100] sm:$0xff] }
  0x80   :  { %1478 = vmatprep.subr.bf16.mxu1 %v1477_v59  ;;  %v91_v59 = vld [vmem:[#allocation2 + $0x118] sm:$0xff] }
  0x81   :  { %254 = vmatmul.mubr.f32.gmra.mrb[4].mxu0 %v62_v63  ;;  %v575_v63 = vld [vmem:[#allocation7 + $0x80] sm:$0xff] }
  0x82   :  { %258 = vmatprep.mubr.f32.mxu0 %v66_v2  ;;  %1457 = vmatpush3.bf16.msra.mxu0 %v1456_v1  ;;  %v1479_v1 = vpack.c.bf16 %v568_v61, %v565_v60  ;;  %v113_v2 = vld [vmem:[#allocation2 + $0x1c8] sm:$0xff]  ;;  %v1481_v3 = vpack.c.bf16 %v575_v63, %v572_v62  ;;  %v94_v60 = vld [vmem:[#allocation2 + $0x130] sm:$0xff]  ;;  %v100_v62 = vld [vmem:[#allocation2 + $0x160] sm:$0xff] }
  0x83   :  { %1458 = vmatprep.subr.bf16.mxu0 %v1691_v0  ;;  %v97_v61 = vld [vmem:[#allocation2 + $0x148] sm:$0xff]  ;;  %v103_v63 = vld [vmem:[#allocation2 + $0x178] sm:$0xff] }
  0x84   :  { %1480 = vmatpush1.bf16.msra.mxu1 %v1479_v1  ;;  %v106_v1 = vld [vmem:[#allocation2 + $0x190] sm:$0xff] }
  0x85   :  { %259 = vmatmul.mubr.f32.gmra.mrb[6].mxu0 %v65_v5  ;;  %v574_v5 = vld [vmem:[#allocation7 + $0x78] sm:$0xff]  ;;  %1482 = vmatprep.subr.bf16.mxu1 %v1481_v3  ;;  %v112_v3 = vld [vmem:[#allocation2 + $0x1c0] sm:$0xff] }
  0x86   :  { %263 = vmatprep.mubr.f32.mxu0 %v69_v7  ;;  %1460 = vmatpush3.bf16.msra.mxu0 %v1459_v6  ;;  %v117_v6 = vld [vmem:[#allocation2 + $0x1e8] sm:$0xff]  ;;  %v578_v7 = vld [vmem:[#allocation7 + $0x98] sm:$0xff]  ;;  %v1483_v9 = vpack.c.bf16 %v574_v5, %v571_v4  ;;  %v115_v4 = vld [vmem:[#allocation2 + $0x1d8] sm:$0xff] }
  0x87   :  { %1461 = vmatprep.subr.bf16.mxu0 %v1691_v0  ;;  %v118_v5 = vld [vmem:[#allocation2 + $0x1f0] sm:$0xff] }
  0x88   :  { %1484 = vmatpush1.bf16.msra.mxu1 %v1483_v9  ;;  %v130_v9 = vld [vmem:[#allocation2 + $0x250] sm:$0xff] }
  0x89   :  { %264 = vmatmul.mubr.f32.gmra.mrb[8].mxu0 %v68_v10  ;;  %v116_v10 = vld [vmem:[#allocation2 + $0x1e0] sm:$0xff] }
  0x8a   :  { %268 = vmatprep.mubr.f32.mxu0 %v72_v12  ;;  %1463 = vmatpush3.bf16.msra.mxu0 %v1462_v11  ;;  %v1485_v11 = vpack.c.bf16 %v581_v8, %v578_v7  ;;  %v577_v12 = vld [vmem:[#allocation7 + $0x90] sm:$0xff]  ;;  %v124_v7 = vld [vmem:[#allocation2 + $0x220] sm:$0xff]  ;;  %v127_v8 = vld [vmem:[#allocation2 + $0x238] sm:$0xff] }
  0x8b   :  { %1464 = vmatprep.subr.bf16.mxu0 %v1691_v0 }
  0x8c   :  { %1486 = vmatprep.subr.bf16.mxu1 %v1485_v11  ;;  %v564_v11 = vld [vmem:[#allocation7 + $0x28] sm:$0xff] }
  0x8d   :  { %269 = vmatmul.mubr.f32.gmra.mrb[10].mxu0 %v71_v15  ;;  %v584_v15 = vld [vmem:[#allocation7 + $0xc8] sm:$0xff] }
  0x8e   :  { %273 = vmatprep.mubr.f32.mxu0 %v75_v17  ;;  %1466 = vmatpush3.bf16.msra.mxu0 %v1465_v16  ;;  %v587_v16 = vld [vmem:[#allocation7 + $0xe0] sm:$0xff]  ;;  %v1487_v17 = vpack.c.bf16 %v580_v13, %v577_v12 }
  0x8f   :  { %1467 = vmatprep.subr.bf16.mxu0 %v1691_v0  ;;  %v1489_v19 = vpack.c.bf16 %v587_v16, %v584_v15  ;;  %v567_v13 = vld [vmem:[#allocation7 + $0x40] sm:$0xff] }
  0x90   :  { %1488 = vmatpush1.bf16.msra.mxu1 %v1487_v17 }
  0x91   :  { %274 = vmatmul.mubr.f32.gmra.mrb[12].mxu0 %v74_v20  ;;  %v583_v20 = vld [vmem:[#allocation7 + $0xc0] sm:$0xff]  ;;  %1490 = vmatprep.subr.bf16.mxu1 %v1489_v19  ;;  %v576_v19 = vld [vmem:[#allocation7 + $0x88] sm:$0xff] }
  0x92   :  { %278 = vmatprep.mubr.f32.mxu0 %v78_v22  ;;  %1469 = vmatpush3.bf16.msra.mxu0 %v1468_v21  ;;  %v586_v21 = vld [vmem:[#allocation7 + $0xd8] sm:$0xff]  ;;  %v123_v22 = vld [vmem:[#allocation2 + $0x218] sm:$0xff] }
  0x93   :  { %1470 = vmatprep.subr.bf16.mxu0 %v1691_v0 }
  0x95   :  { %279 = vmatmul.mubr.f32.gmra.mrb[14].mxu0 %v77_v25  ;;  %v1491_v25 = vpack.c.bf16 %v586_v21, %v583_v20 }
  0x96   :  { %283 = vmatprep.mubr.f32.mxu0 %v81_v27  ;;  %1472 = vmatpush3.bf16.msra.mxu0 %v1471_v26  ;;  %v122_v26 = vld [vmem:[#allocation2 + $0x210] sm:$0xff]  ;;  %v1493_v27 = vpack.c.bf16 %v593_v24, %v590_v23  ;;  %v579_v23 = vld [vmem:[#allocation7 + $0xa0] sm:$0xff] }
  0x97   :  { %1492 = vmatpush1.bf16.msra.mxu1 %v1491_v25  ;;  %v582_v24 = vld [vmem:[#allocation7 + $0xb8] sm:$0xff] }
  0x98   :  { %1494 = vmatprep.subr.bf16.mxu1 %v1493_v27  ;;  %v1515_v27 = vpack.c.bf16 %v582_v24, %v579_v23 }
  0x99   :  { %284 = vmatmul.mubr.f32.gmra.mrb[16].mxu0 %v80_v28  ;;  %v589_v28 = vld [vmem:[#allocation7 + $0xf0] sm:$0xff] }
  0x9a   :  { %288 = vmatprep.mubr.f32.mxu0 %v84_v29  ;;  %v592_v29 = vld [vmem:[#allocation7 + $0x108] sm:$0xff] }
  0x9d   :  { %289 = vmatmul.mubr.f32.gmra.mrb[18].mxu0 %v83_v30  ;;  %v126_v30 = vld [vmem:[#allocation2 + $0x230] sm:$0xff] }
  0x9e   :  { %293 = vmatprep.mubr.f32.mxu0 %v87_v31  ;;  %v596_v31 = vld [vmem:[#allocation7 + $0x128] sm:$0xff] }
  0xa1   :  { %294 = vmatmul.mubr.f32.gmra.mrb[20].mxu0 %v86_v33  ;;  %v599_v33 = vld [vmem:[#allocation7 + $0x140] sm:$0xff] }
  0xa2   :  { %298 = vmatprep.mubr.f32.mxu0 %v90_v34  ;;  %v1495_v34 = vpack.c.bf16 %v592_v29, %v589_v28  ;;  %v585_v28 = vld [vmem:[#allocation7 + $0xd0] sm:$0xff]  ;;  %v588_v29 = vld [vmem:[#allocation7 + $0xe8] sm:$0xff] }
  0xa4   :  { %1496 = vmatpush1.bf16.msra.mxu1 %v1495_v34  ;;  %v591_v34 = vld [vmem:[#allocation7 + $0x100] sm:$0xff] }
  0xa5   :  { %299 = vmatmul.mubr.f32.gmra.mrb[22].mxu0 %v89_v35  ;;  %v125_v35 = vld [vmem:[#allocation2 + $0x228] sm:$0xff] }
  0xa6   :  { %303 = vmatprep.mubr.f32.mxu0 %v93_v36  ;;  %v1497_v36 = vpack.c.bf16 %v599_v33, %v596_v31  ;;  %v1518_v33 = vpack.c.bf16 %v588_v29, %v585_v28 }
  0xa8   :  { %1498 = vmatprep.subr.bf16.mxu1 %v1497_v36 }
  0xa9   :  { %304 = vmatmul.mubr.f32.gmra.mrb[24].mxu0 %v92_v37  ;;  %v595_v37 = vld [vmem:[#allocation7 + $0x120] sm:$0xff] }
  0xaa   :  { %308 = vmatprep.mubr.f32.mxu0 %v96_v38  ;;  %v598_v38 = vld [vmem:[#allocation7 + $0x138] sm:$0xff] }
  0xad   :  { %309 = vmatmul.mubr.f32.gmra.mrb[26].mxu0 %v95_v39  ;;  %v129_v39 = vld [vmem:[#allocation2 + $0x248] sm:$0xff] }
  0xae   :  { %313 = vmatprep.mubr.f32.mxu0 %v99_v40  ;;  %v602_v40 = vld [vmem:[#allocation7 + $0x158] sm:$0xff] }
  0xb1   :  { %314 = vmatmul.mubr.f32.gmra.mrb[28].mxu0 %v98_v41  ;;  %v605_v41 = vld [vmem:[#allocation7 + $0x170] sm:$0xff] }
  0xb2   :  { %318 = vmatprep.mubr.f32.mxu0 %v102_v42  ;;  %v1499_v42 = vpack.c.bf16 %v598_v38, %v595_v37 }
  0xb4   :  { %1500 = vmatpush1.bf16.msra.mxu1 %v1499_v42 }
  0xb5   :  { %319 = vmatmul.mubr.f32.gmra.mrb[30].mxu0 %v101_v43  ;;  %v128_v43 = vld [vmem:[#allocation2 + $0x240] sm:$0xff] }
  0xb6   :  { %323 = vmatprep.mubr.f32.mxu0 %v105_v44  ;;  %v1501_v44 = vpack.c.bf16 %v605_v41, %v602_v40  ;;  %v600_v40 = vld [vmem:[#allocation7 + $0x148] sm:$0xff] }
  0xb8   :  { %1502 = vmatprep.subr.bf16.mxu1 %v1501_v44  ;;  %v603_v44 = vld [vmem:[#allocation7 + $0x160] sm:$0xff] }
  0xb9   :  { %324 = vmatmul.mubr.f32.gmra.mrb[32].mxu0 %v104_v45  ;;  %v601_v45 = vld [vmem:[#allocation7 + $0x150] sm:$0xff] }
  0xba   :  { %328 = vmatprep.mubr.f32.mxu0 %v108_v46  ;;  %v604_v46 = vld [vmem:[#allocation7 + $0x168] sm:$0xff] }
  0xbd   :  { %329 = vmatmul.mubr.f32.gmra.mrb[34].mxu0 %v107_v47  ;;  %v1503_v47 = vpack.c.bf16 %v604_v46, %v601_v45  ;;  %v606_v45 = vld [vmem:[#allocation7 + $0x178] sm:$0xff] }
  0xbe   :  { %333 = vmatprep.mubr.f32.mxu0 %v111_v48  ;;  %v58_v48 = vld [vmem:[#allocation2 + $0x10] sm:$0xff] }
  0xbf   :  { %1504 = vmatpush1.bf16.msra.mxu1 %v1503_v47 }
  0xc0   :  { %1505 = vmatprep.subr.bf16.mxu1 %v1691_v0 }
  0xc1   :  { %334 = vmatmul.mubr.f32.gmra.mrb[36].mxu0 %v110_v49  ;;  %v61_v49 = vld [vmem:[#allocation2 + $0x28] sm:$0xff] }
  0xc2   :  { %338 = vmatprep.mubr.f32.mxu0 %v114_v50  ;;  %v64_v50 = vld [vmem:[#allocation2 + $0x40] sm:$0xff] }
  0xc5   :  { %339 = vmatmul.mubr.f32.gmra.mrb[38].mxu0 %v113_v2  ;;  %v109_v2 = vld [vmem:[#allocation2 + $0x1a8] sm:$0xff] }
  0xc6   :  { %343 = vmatprep.mubr.f32.mxu0 %v117_v6  ;;  %v121_v6 = vld [vmem:[#allocation2 + $0x208] sm:$0xff] }
  0xc9   :  { %344 = vmatmul.mubr.f32.gmra.mrb[40].mxu0 %v116_v10  ;;  %v561_v10 = vld [vmem:[#allocation7 + $0x10] sm:$0xff] }
  0xca   :  { %348 = vmatprep.mubr.f32.mxu0 %v120_v14  ;;  %v1506_v12 = vpack.c.bf16 %v564_v11, %v561_v10  ;;  %v570_v14 = vld [vmem:[#allocation7 + $0x58] sm:$0xff] }
  0xcb   :  { %v1509_v17 = vpack.c.bf16 %v570_v14, %v567_v13 }
  0xcd   :  { %349 = vmatmul.mubr.f32.gmra.mrb[42].mxu0 %v119_v18  ;;  %v573_v18 = vld [vmem:[#allocation7 + $0x70] sm:$0xff] }
  0xce   :  { %353 = vmatprep.mubr.f32.mxu0 %v123_v22  ;;  %v1512_v22 = vpack.c.bf16 %v576_v19, %v573_v18 }
  0xd1   :  { %354 = vmatmul.mubr.f32.gmra.mrb[44].mxu0 %v122_v26 }
  0xd2   :  { %358 = vmatprep.mubr.f32.mxu0 %v126_v30 }
  0xd5   :  { %359 = vmatmul.mubr.f32.gmra.mrb[46].mxu0 %v125_v35  ;;  %v594_v35 = vld [vmem:[#allocation7 + $0x118] sm:$0xff] }
  0xd6   :  { %363 = vmatprep.mubr.f32.mxu0 %v129_v39  ;;  %v1521_v38 = vpack.c.bf16 %v594_v35, %v591_v34  ;;  %v597_v39 = vld [vmem:[#allocation7 + $0x130] sm:$0xff] }
  0xd9   :  { %364 = vmatmul.mubr.f32.gmra.mrb[48].mxu0 %v128_v43  ;;  %v1524_v43 = vpack.c.bf16 %v600_v40, %v597_v39 }
  0xda   :  { %1219 = vmatprep.mubr.msk.f32.mxu0 %vm1693_vm0, %v1692_v32 }
  0xdd   :  { %1220 = vmatmul.mubr.f32.vlgmr.msra.gmra.mrb[0].mxu0 %v58_v48  ;;  %v1527_v48 = vpack.c.bf16 %v606_v45, %v603_v44 }
  0xde   :  { %1222 = vmatprep.mubr.msk.f32.mxu0 %vm1693_vm0, %v1692_v32 }
  0xe1   :  { %1223 = vmatmul.mubr.f32.gmra.mrb[2].mxu0 %v61_v49 }
  0xe2   :  { %1225 = vmatprep.mubr.msk.f32.mxu0 %vm1693_vm0, %v1692_v32 }
  0xe5   :  { %1226 = vmatmul.mubr.f32.gmra.mrb[4].mxu0 %v64_v50 }
  0xe6   :  { %1228 = vmatprep.mubr.msk.f32.mxu0 %vm1693_vm0, %v1692_v32 }
  0xe9   :  { %1229 = vmatmul.mubr.f32.gmra.mrb[6].mxu0 %v67_v51 }
  0xea   :  { %1231 = vmatprep.mubr.msk.f32.mxu0 %vm1693_vm0, %v1692_v32 }
  0xed   :  { %1232 = vmatmul.mubr.f32.gmra.mrb[8].mxu0 %v70_v52 }
  0xee   :  { %1234 = vmatprep.mubr.msk.f32.mxu0 %vm1693_vm0, %v1692_v32 }
  0xf1   :  { %1235 = vmatmul.mubr.f32.gmra.mrb[10].mxu0 %v73_v53 }
  0xf2   :  { %1237 = vmatprep.mubr.msk.f32.mxu0 %vm1693_vm0, %v1692_v32 }
  0xf5   :  { %1238 = vmatmul.mubr.f32.gmra.mrb[12].mxu0 %v76_v54 }
  0xf6   :  { %1240 = vmatprep.mubr.msk.f32.mxu0 %vm1693_vm0, %v1692_v32 }
  0xf9   :  { %1241 = vmatmul.mubr.f32.gmra.mrb[14].mxu0 %v79_v55 }
  0xfa   :  { %1243 = vmatprep.mubr.msk.f32.mxu0 %vm1693_vm0, %v1692_v32 }
  0xfd   :  { %1244 = vmatmul.mubr.f32.gmra.mrb[16].mxu0 %v82_v56 }
  0xfe   :  { %1246 = vmatprep.mubr.msk.f32.mxu0 %vm1693_vm0, %v1692_v32 }
 0x101   :  { %1247 = vmatmul.mubr.f32.gmra.mrb[18].mxu0 %v85_v57 }
 0x102   :  { %1249 = vmatprep.mubr.msk.f32.mxu0 %vm1693_vm0, %v1692_v32 }
 0x105   :  { %1250 = vmatmul.mubr.f32.gmra.mrb[20].mxu0 %v88_v58 }
 0x106   :  { %1252 = vmatprep.mubr.msk.f32.mxu0 %vm1693_vm0, %v1692_v32 }
 0x109   :  { %1253 = vmatmul.mubr.f32.gmra.mrb[22].mxu0 %v91_v59 }
 0x10a   :  { %1255 = vmatprep.mubr.msk.f32.mxu0 %vm1693_vm0, %v1692_v32 }
 0x10d   :  { %1256 = vmatmul.mubr.f32.gmra.mrb[24].mxu0 %v94_v60 }
 0x10e   :  { %1258 = vmatprep.mubr.msk.f32.mxu0 %vm1693_vm0, %v1692_v32 }
 0x111   :  { %1259 = vmatmul.mubr.f32.gmra.mrb[26].mxu0 %v97_v61 }
 0x112   :  { %1261 = vmatprep.mubr.msk.f32.mxu0 %vm1693_vm0, %v1692_v32 }
 0x115   :  { %1262 = vmatmul.mubr.f32.gmra.mrb[28].mxu0 %v100_v62 }
 0x116   :  { %1264 = vmatprep.mubr.msk.f32.mxu0 %vm1693_vm0, %v1692_v32 }
 0x119   :  { %1265 = vmatmul.mubr.f32.gmra.mrb[30].mxu0 %v103_v63 }
 0x11a   :  { %1267 = vmatprep.mubr.msk.f32.mxu0 %vm1693_vm0, %v1692_v32 }
 0x11d   :  { %1268 = vmatmul.mubr.f32.gmra.mrb[32].mxu0 %v106_v1 }
 0x11e   :  { %1270 = vmatprep.mubr.msk.f32.mxu0 %vm1693_vm0, %v1692_v32 }
 0x121   :  { %1271 = vmatmul.mubr.f32.gmra.mrb[34].mxu0 %v109_v2 }
 0x122   :  { %1273 = vmatprep.mubr.msk.f32.mxu0 %vm1693_vm0, %v1692_v32 }
 0x125   :  { %1274 = vmatmul.mubr.f32.gmra.mrb[36].mxu0 %v112_v3 }
 0x126   :  { %1276 = vmatprep.mubr.msk.f32.mxu0 %vm1693_vm0, %v1692_v32 }
 0x129   :  { %1277 = vmatmul.mubr.f32.gmra.mrb[38].mxu0 %v115_v4 }
 0x12a   :  { %1279 = vmatprep.mubr.msk.f32.mxu0 %vm1693_vm0, %v1692_v32 }
 0x12d   :  { %1280 = vmatmul.mubr.f32.gmra.mrb[40].mxu0 %v118_v5 }
 0x12e   :  { %1282 = vmatprep.mubr.msk.f32.mxu0 %vm1693_vm0, %v1692_v32 }
 0x131   :  { %1283 = vmatmul.mubr.f32.gmra.mrb[42].mxu0 %v121_v6 }
 0x132   :  { %1285 = vmatprep.mubr.msk.f32.mxu0 %vm1693_vm0, %v1692_v32 }
 0x135   :  { %1286 = vmatmul.mubr.f32.gmra.mrb[44].mxu0 %v124_v7 }
 0x136   :  { %1288 = vmatprep.mubr.msk.f32.mxu0 %vm1693_vm0, %v1692_v32 }
 0x139   :  { %1289 = vmatmul.mubr.f32.gmra.mrb[46].mxu0 %v127_v8 }
 0x13a   :  { %1291 = vmatprep.mubr.msk.f32.mxu0 %vm1693_vm0, %v1692_v32 }
 0x13d   :  { %1292 = vmatmul.mubr.f32.gmra.mrb[48].mxu0 %v130_v9 }
 0x1b0   :  { %v1833_v15 = vpop.f32.mrb[0].mxu0 }
 0x1b1   :  { %v1221_v16 = vpop.f32.mrb[1].mxu0  ;;  %672 = vmatmul.mubr.f32.vlgmr.msra.gmra.mrb[0].mxu1 %v1833_v15 }
 0x1b2   :  { %1507 = vmatpush3.bf16.msra.mxu1 %v1506_v12  ;;  %677 = vmatprep.mubr.f32.mxu1 %v1692_v32 }
 0x1b3   :  { %1508 = vmatprep.subr.bf16.mxu1 %v1691_v0 }
 0x1b4   :  { %v1838_v20 = vpop.f32.mrb[2].mxu0 }
 0x1b5   :  { %v1224_v21 = vpop.f32.mrb[3].mxu0  ;;  %678 = vmatmul.mubr.f32.gmra.mrb[2].mxu1 %v1838_v20 }
 0x1b6   :  { %683 = vmatprep.mubr.f32.mxu1 %v1692_v32  ;;  %1510 = vmatpush3.bf16.msra.mxu1 %v1509_v17 }
 0x1b7   :  { %1511 = vmatprep.subr.bf16.mxu1 %v1691_v0 }
 0x1b8   :  { %v1843_v25 = vpop.f32.mrb[4].mxu0 }
 0x1b9   :  { %v1227_v26 = vpop.f32.mrb[5].mxu0  ;;  %684 = vmatmul.mubr.f32.gmra.mrb[4].mxu1 %v1843_v25 }
 0x1ba   :  { %689 = vmatprep.mubr.f32.mxu1 %v1692_v32  ;;  %1513 = vmatpush3.bf16.msra.mxu1 %v1512_v22 }
 0x1bb   :  { %1514 = vmatprep.subr.bf16.mxu1 %v1691_v0 }
 0x1bc   :  { %v1848_v30 = vpop.f32.mrb[6].mxu0 }
 0x1bd   :  { %v1230_v31 = vpop.f32.mrb[7].mxu0  ;;  %690 = vmatmul.mubr.f32.gmra.mrb[6].mxu1 %v1848_v30 }
 0x1be   :  { %695 = vmatprep.mubr.f32.mxu1 %v1692_v32  ;;  %1516 = vmatpush3.bf16.msra.mxu1 %v1515_v27 }
 0x1bf   :  { %1517 = vmatprep.subr.bf16.mxu1 %v1691_v0 }
 0x1c0   :  { %v1853_v36 = vpop.f32.mrb[8].mxu0 }
 0x1c1   :  { %v1233_v37 = vpop.f32.mrb[9].mxu0  ;;  %696 = vmatmul.mubr.f32.gmra.mrb[8].mxu1 %v1853_v36 }
 0x1c2   :  { %701 = vmatprep.mubr.f32.mxu1 %v1692_v32  ;;  %1519 = vmatpush3.bf16.msra.mxu1 %v1518_v33 }
 0x1c3   :  { %1520 = vmatprep.subr.bf16.mxu1 %v1691_v0 }
 0x1c4   :  { %v1858_v41 = vpop.f32.mrb[10].mxu0 }
 0x1c5   :  { %v1236_v42 = vpop.f32.mrb[11].mxu0  ;;  %702 = vmatmul.mubr.f32.gmra.mrb[10].mxu1 %v1858_v41 }
 0x1c6   :  { %707 = vmatprep.mubr.f32.mxu1 %v1692_v32  ;;  %1522 = vmatpush3.bf16.msra.mxu1 %v1521_v38 }
 0x1c7   :  { %1523 = vmatprep.subr.bf16.mxu1 %v1691_v0 }
 0x1c8   :  { %v1863_v46 = vpop.f32.mrb[12].mxu0 }
 0x1c9   :  { %v1239_v47 = vpop.f32.mrb[13].mxu0  ;;  %708 = vmatmul.mubr.f32.gmra.mrb[12].mxu1 %v1863_v46 }
 0x1ca   :  { %713 = vmatprep.mubr.f32.mxu1 %v1692_v32  ;;  %1525 = vmatpush3.bf16.msra.mxu1 %v1524_v43 }
 0x1cb   :  { %1526 = vmatprep.subr.bf16.mxu1 %v1691_v0 }
 0x1cc   :  { %v1868_v49 = vpop.f32.mrb[14].mxu0 }
 0x1cd   :  { %v1242_v50 = vpop.f32.mrb[15].mxu0  ;;  %714 = vmatmul.mubr.f32.gmra.mrb[14].mxu1 %v1868_v49 }
 0x1ce   :  { %719 = vmatprep.mubr.f32.mxu1 %v1692_v32  ;;  %1528 = vmatpush3.bf16.msra.mxu1 %v1527_v48 }
 0x1d0   :  { %v1872_v51 = vpop.f32.mrb[16].mxu0 }
 0x1d1   :  { %v1245_v52 = vpop.f32.mrb[17].mxu0  ;;  %720 = vmatmul.mubr.f32.gmra.mrb[16].mxu1 %v1872_v51 }
 0x1d2   :  { %725 = vmatprep.mubr.f32.mxu1 %v1692_v32 }
 0x1d4   :  { %v1876_v53 = vpop.f32.mrb[18].mxu0 }
 0x1d5   :  { %v1248_v54 = vpop.f32.mrb[19].mxu0  ;;  %726 = vmatmul.mubr.f32.gmra.mrb[18].mxu1 %v1876_v53 }
 0x1d6   :  { %731 = vmatprep.mubr.f32.mxu1 %v1692_v32 }
 0x1d8   :  { %v1880_v0 = vpop.f32.mrb[20].mxu0 }
 0x1d9   :  { %v1251_v55 = vpop.f32.mrb[21].mxu0  ;;  %732 = vmatmul.mubr.f32.gmra.mrb[20].mxu1 %v1880_v0 }
 0x1da   :  { %737 = vmatprep.mubr.f32.mxu1 %v1692_v32 }
 0x1dc   :  { %v1884_v56 = vpop.f32.mrb[22].mxu0 }
 0x1dd   :  { %v1254_v57 = vpop.f32.mrb[23].mxu0  ;;  %738 = vmatmul.mubr.f32.gmra.mrb[22].mxu1 %v1884_v56 }
 0x1de   :  { %743 = vmatprep.mubr.f32.mxu1 %v1692_v32 }
 0x1e0   :  { %v1888_v58 = vpop.f32.mrb[24].mxu0 }
 0x1e1   :  { %v1257_v59 = vpop.f32.mrb[25].mxu0  ;;  %744 = vmatmul.mubr.f32.gmra.mrb[24].mxu1 %v1888_v58 }
 0x1e2   :  { %749 = vmatprep.mubr.f32.mxu1 %v1692_v32 }
 0x1e4   :  { %v1892_v60 = vpop.f32.mrb[26].mxu0 }
 0x1e5   :  { %v1260_v61 = vpop.f32.mrb[27].mxu0  ;;  %750 = vmatmul.mubr.f32.gmra.mrb[26].mxu1 %v1892_v60 }
 0x1e6   :  { %755 = vmatprep.mubr.f32.mxu1 %v1692_v32 }
 0x1e8   :  { %v1896_v62 = vpop.f32.mrb[28].mxu0 }
 0x1e9   :  { %v1263_v63 = vpop.f32.mrb[29].mxu0  ;;  %756 = vmatmul.mubr.f32.gmra.mrb[28].mxu1 %v1896_v62 }
 0x1ea   :  { %761 = vmatprep.mubr.f32.mxu1 %v1692_v32 }
 0x1ec   :  { %v1900_v1 = vpop.f32.mrb[30].mxu0 }
 0x1ed   :  { %v1266_v2 = vpop.f32.mrb[31].mxu0  ;;  %762 = vmatmul.mubr.f32.gmra.mrb[30].mxu1 %v1900_v1 }
 0x1ee   :  { %767 = vmatprep.mubr.f32.mxu1 %v1692_v32 }
 0x1f0   :  { %v1904_v3 = vpop.f32.mrb[32].mxu0 }
 0x1f1   :  { %v1269_v4 = vpop.f32.mrb[33].mxu0  ;;  %768 = vmatmul.mubr.f32.gmra.mrb[32].mxu1 %v1904_v3 }
 0x1f2   :  { %773 = vmatprep.mubr.f32.mxu1 %v1692_v32 }
 0x1f4   :  { %v1908_v5 = vpop.f32.mrb[34].mxu0 }
 0x1f5   :  { %v1272_v6 = vpop.f32.mrb[35].mxu0  ;;  %774 = vmatmul.mubr.f32.gmra.mrb[34].mxu1 %v1908_v5 }
 0x1f6   :  { %779 = vmatprep.mubr.f32.mxu1 %v1692_v32 }
 0x1f8   :  { %v1912_v7 = vpop.f32.mrb[36].mxu0 }
 0x1f9   :  { %v1275_v8 = vpop.f32.mrb[37].mxu0  ;;  %780 = vmatmul.mubr.f32.gmra.mrb[36].mxu1 %v1912_v7 }
 0x1fa   :  { %785 = vmatprep.mubr.f32.mxu1 %v1692_v32 }
 0x1fc   :  { %v530_v9 = vpop.f32.mrb[38].mxu0 }
 0x1fd   :  { %v1278_v10 = vpop.f32.mrb[39].mxu0  ;;  %786 = vmatmul.mubr.f32.gmra.mrb[38].mxu1 %v530_v9 }
 0x1fe   :  { %791 = vmatprep.mubr.f32.mxu1 %v1692_v32 }
 0x200   :  { %v535_v11 = vpop.f32.mrb[40].mxu0 }
 0x201   :  { %v1281_v12 = vpop.f32.mrb[41].mxu0  ;;  %792 = vmatmul.mubr.f32.gmra.mrb[40].mxu1 %v535_v11 }
 0x202   :  { %797 = vmatprep.mubr.f32.mxu1 %v1692_v32 }
 0x204   :  { %v540_v13 = vpop.f32.mrb[42].mxu0 }
 0x205   :  { %v1284_v14 = vpop.f32.mrb[43].mxu0  ;;  %798 = vmatmul.mubr.f32.gmra.mrb[42].mxu1 %v540_v13 }
 0x206   :  { %803 = vmatprep.mubr.f32.mxu1 %v1692_v32 }
 0x208   :  { %v545_v16 = vpop.f32.mrb[44].mxu0 }
 0x209   :  { %v1287_v17 = vpop.f32.mrb[45].mxu0  ;;  %804 = vmatmul.mubr.f32.gmra.mrb[44].mxu1 %v545_v16 }
 0x20a   :  { %809 = vmatprep.mubr.f32.mxu1 %v1692_v32 }
 0x20c   :  { %v550_v18 = vpop.f32.mrb[46].mxu0 }
 0x20d   :  { %v1290_v19 = vpop.f32.mrb[47].mxu0  ;;  %810 = vmatmul.mubr.f32.gmra.mrb[46].mxu1 %v550_v18 }
 0x20e   :  { %815 = vmatprep.mubr.f32.mxu1 %v1692_v32 }
 0x210   :  { %v555_v21 = vpop.f32.mrb[48].mxu0 }
 0x211   :  { %v1293_v22 = vpop.f32.mrb[49].mxu0  ;;  %816 = vmatmul.mubr.f32.gmra.mrb[48].mxu1 %v555_v21 }
 0x212   :  { %1326 = vmatprep.mubr.msk.f32.mxu1 %vm1693_vm0, %v1692_v32 }
 0x215   :  { %1327 = vmatmul.mubr.f32.vlgmr.msra.gmra.mrb[50].mxu1 %v1833_v15 }
 0x216   :  { %1329 = vmatprep.mubr.msk.f32.mxu1 %vm1693_vm0, %v1692_v32 }
 0x219   :  { %1330 = vmatmul.mubr.f32.gmra.mrb[52].mxu1 %v1838_v20 }
 0x21a   :  { %1332 = vmatprep.mubr.msk.f32.mxu1 %vm1693_vm0, %v1692_v32 }
 0x21d   :  { %1333 = vmatmul.mubr.f32.gmra.mrb[54].mxu1 %v1843_v25 }
 0x21e   :  { %1335 = vmatprep.mubr.msk.f32.mxu1 %vm1693_vm0, %v1692_v32 }
 0x221   :  { %1336 = vmatmul.mubr.f32.gmra.mrb[56].mxu1 %v1848_v30 }
 0x222   :  { %1338 = vmatprep.mubr.msk.f32.mxu1 %vm1693_vm0, %v1692_v32 }
 0x225   :  { %1339 = vmatmul.mubr.f32.gmra.mrb[58].mxu1 %v1853_v36 }
 0x226   :  { %1341 = vmatprep.mubr.msk.f32.mxu1 %vm1693_vm0, %v1692_v32 }
 0x229   :  { %1342 = vmatmul.mubr.f32.gmra.mrb[60].mxu1 %v1858_v41 }
 0x22a   :  { %1344 = vmatprep.mubr.msk.f32.mxu1 %vm1693_vm0, %v1692_v32 }
 0x22d   :  { %1345 = vmatmul.mubr.f32.gmra.mrb[62].mxu1 %v1863_v46 }
 0x22e   :  { %1347 = vmatprep.mubr.msk.f32.mxu1 %vm1693_vm0, %v1692_v32 }
 0x231   :  { %1348 = vmatmul.mubr.f32.gmra.mrb[64].mxu1 %v1868_v49 }
 0x232   :  { %1350 = vmatprep.mubr.msk.f32.mxu1 %vm1693_vm0, %v1692_v32 }
 0x235   :  { %1351 = vmatmul.mubr.f32.gmra.mrb[66].mxu1 %v1872_v51 }
 0x236   :  { %1353 = vmatprep.mubr.msk.f32.mxu1 %vm1693_vm0, %v1692_v32 }
 0x239   :  { %1354 = vmatmul.mubr.f32.gmra.mrb[68].mxu1 %v1876_v53 }
 0x23a   :  { %1356 = vmatprep.mubr.msk.f32.mxu1 %vm1693_vm0, %v1692_v32 }
 0x23d   :  { %1357 = vmatmul.mubr.f32.gmra.mrb[70].mxu1 %v1880_v0 }
 0x23e   :  { %1359 = vmatprep.mubr.msk.f32.mxu1 %vm1693_vm0, %v1692_v32 }
 0x241   :  { %1360 = vmatmul.mubr.f32.gmra.mrb[72].mxu1 %v1884_v56 }
 0x242   :  { %1362 = vmatprep.mubr.msk.f32.mxu1 %vm1693_vm0, %v1692_v32 }
 0x245   :  { %1363 = vmatmul.mubr.f32.gmra.mrb[74].mxu1 %v1888_v58 }
 0x246   :  { %1365 = vmatprep.mubr.msk.f32.mxu1 %vm1693_vm0, %v1692_v32 }
 0x249   :  { %1366 = vmatmul.mubr.f32.gmra.mrb[76].mxu1 %v1892_v60 }
 0x24a   :  { %1368 = vmatprep.mubr.msk.f32.mxu1 %vm1693_vm0, %v1692_v32 }
 0x24d   :  { %1369 = vmatmul.mubr.f32.gmra.mrb[78].mxu1 %v1896_v62 }
 0x24e   :  { %1371 = vmatprep.mubr.msk.f32.mxu1 %vm1693_vm0, %v1692_v32 }
 0x251   :  { %1372 = vmatmul.mubr.f32.gmra.mrb[80].mxu1 %v1900_v1 }
 0x252   :  { %1374 = vmatprep.mubr.msk.f32.mxu1 %vm1693_vm0, %v1692_v32 }
 0x255   :  { %1375 = vmatmul.mubr.f32.gmra.mrb[82].mxu1 %v1904_v3 }
 0x256   :  { %1377 = vmatprep.mubr.msk.f32.mxu1 %vm1693_vm0, %v1692_v32 }
 0x259   :  { %1378 = vmatmul.mubr.f32.gmra.mrb[84].mxu1 %v1908_v5 }
 0x25a   :  { %1380 = vmatprep.mubr.msk.f32.mxu1 %vm1693_vm0, %v1692_v32 }
 0x25d   :  { %1381 = vmatmul.mubr.f32.gmra.mrb[86].mxu1 %v1912_v7 }
 0x25e   :  { %1383 = vmatprep.mubr.msk.f32.mxu1 %vm1693_vm0, %v1692_v32 }
 0x261   :  { %1384 = vmatmul.mubr.f32.gmra.mrb[88].mxu1 %v530_v9 }
 0x262   :  { %1386 = vmatprep.mubr.msk.f32.mxu1 %vm1693_vm0, %v1692_v32 }
 0x265   :  { %1387 = vmatmul.mubr.f32.gmra.mrb[90].mxu1 %v535_v11 }
 0x266   :  { %1389 = vmatprep.mubr.msk.f32.mxu1 %vm1693_vm0, %v1692_v32 }
 0x269   :  { %1390 = vmatmul.mubr.f32.gmra.mrb[92].mxu1 %v540_v13 }
 0x26a   :  { %1392 = vmatprep.mubr.msk.f32.mxu1 %vm1693_vm0, %v1692_v32 }
 0x26d   :  { %1393 = vmatmul.mubr.f32.gmra.mrb[94].mxu1 %v545_v16 }
 0x26e   :  { %1395 = vmatprep.mubr.msk.f32.mxu1 %vm1693_vm0, %v1692_v32 }
 0x271   :  { %1396 = vmatmul.mubr.f32.gmra.mrb[96].mxu1 %v550_v18 }
 0x272   :  { %1398 = vmatprep.mubr.msk.f32.mxu1 %vm1693_vm0, %v1692_v32 }
 0x275   :  { %1399 = vmatmul.mubr.f32.gmra.mrb[98].mxu1 %v555_v21 }
 0x284   :  { %v673_v15 = vpop.f32.mrb[0].mxu1 }
 0x285   :  { %1012 = vst [vmem:[#allocation8] sm:$0xff] %v673_v15  ;;  %v675_v20 = vpop.f32.mrb[1].mxu1 }
 0x286   :  { %1013 = vst [vmem:[#allocation8 + $0x8] sm:$0xff] %v675_v20 }
 0x288   :  { %v679_v23 = vpop.f32.mrb[2].mxu1 }
 0x289   :  { %1015 = vst [vmem:[#allocation8 + $0x18] sm:$0xff] %v679_v23  ;;  %v681_v24 = vpop.f32.mrb[3].mxu1 }
 0x28a   :  { %1016 = vst [vmem:[#allocation8 + $0x20] sm:$0xff] %v681_v24 }
 0x28c   :  { %v685_v25 = vpop.f32.mrb[4].mxu1 }
 0x28d   :  { %1018 = vst [vmem:[#allocation8 + $0x30] sm:$0xff] %v685_v25  ;;  %v687_v26 = vpop.f32.mrb[5].mxu1 }
 0x28e   :  { %1019 = vst [vmem:[#allocation8 + $0x38] sm:$0xff] %v687_v26 }
 0x290   :  { %v691_v27 = vpop.f32.mrb[6].mxu1 }
 0x291   :  { %1021 = vst [vmem:[#allocation8 + $0x48] sm:$0xff] %v691_v27  ;;  %v693_v28 = vpop.f32.mrb[7].mxu1 }
 0x292   :  { %1022 = vst [vmem:[#allocation8 + $0x50] sm:$0xff] %v693_v28 }
 0x294   :  { %v697_v29 = vpop.f32.mrb[8].mxu1 }
 0x295   :  { %1024 = vst [vmem:[#allocation8 + $0x60] sm:$0xff] %v697_v29  ;;  %v699_v32 = vpop.f32.mrb[9].mxu1 }
 0x296   :  { %1025 = vst [vmem:[#allocation8 + $0x68] sm:$0xff] %v699_v32 }
 0x298   :  { %v703_v30 = vpop.f32.mrb[10].mxu1 }
 0x299   :  { %1027 = vst [vmem:[#allocation8 + $0x78] sm:$0xff] %v703_v30  ;;  %v705_v31 = vpop.f32.mrb[11].mxu1 }
 0x29a   :  { %1028 = vst [vmem:[#allocation8 + $0x80] sm:$0xff] %v705_v31 }
 0x29c   :  { %v709_v33 = vpop.f32.mrb[12].mxu1 }
 0x29d   :  { %1030 = vst [vmem:[#allocation8 + $0x90] sm:$0xff] %v709_v33  ;;  %v711_v34 = vpop.f32.mrb[13].mxu1 }
 0x29e   :  { %1031 = vst [vmem:[#allocation8 + $0x98] sm:$0xff] %v711_v34 }
 0x2a0   :  { %v715_v35 = vpop.f32.mrb[14].mxu1 }
 0x2a1   :  { %1033 = vst [vmem:[#allocation8 + $0xa8] sm:$0xff] %v715_v35  ;;  %v717_v36 = vpop.f32.mrb[15].mxu1 }
 0x2a2   :  { %1034 = vst [vmem:[#allocation8 + $0xb0] sm:$0xff] %v717_v36 }
 0x2a4   :  { %v721_v37 = vpop.f32.mrb[16].mxu1 }
 0x2a5   :  { %1036 = vst [vmem:[#allocation8 + $0xc0] sm:$0xff] %v721_v37  ;;  %v723_v38 = vpop.f32.mrb[17].mxu1 }
 0x2a6   :  { %1037 = vst [vmem:[#allocation8 + $0xc8] sm:$0xff] %v723_v38 }
 0x2a8   :  { %v727_v39 = vpop.f32.mrb[18].mxu1 }
 0x2a9   :  { %1039 = vst [vmem:[#allocation8 + $0xd8] sm:$0xff] %v727_v39  ;;  %v729_v40 = vpop.f32.mrb[19].mxu1 }
 0x2aa   :  { %1040 = vst [vmem:[#allocation8 + $0xe0] sm:$0xff] %v729_v40 }
 0x2ac   :  { %v733_v41 = vpop.f32.mrb[20].mxu1 }
 0x2ad   :  { %1042 = vst [vmem:[#allocation8 + $0xf0] sm:$0xff] %v733_v41  ;;  %v735_v42 = vpop.f32.mrb[21].mxu1 }
 0x2ae   :  { %1043 = vst [vmem:[#allocation8 + $0xf8] sm:$0xff] %v735_v42 }
 0x2b0   :  { %v739_v43 = vpop.f32.mrb[22].mxu1 }
 0x2b1   :  { %1045 = vst [vmem:[#allocation8 + $0x108] sm:$0xff] %v739_v43  ;;  %v741_v44 = vpop.f32.mrb[23].mxu1 }
 0x2b2   :  { %1046 = vst [vmem:[#allocation8 + $0x110] sm:$0xff] %v741_v44 }
 0x2b4   :  { %v745_v45 = vpop.f32.mrb[24].mxu1 }
 0x2b5   :  { %1048 = vst [vmem:[#allocation8 + $0x120] sm:$0xff] %v745_v45  ;;  %v747_v46 = vpop.f32.mrb[25].mxu1 }
 0x2b6   :  { %1049 = vst [vmem:[#allocation8 + $0x128] sm:$0xff] %v747_v46 }
 0x2b8   :  { %v751_v47 = vpop.f32.mrb[26].mxu1 }
 0x2b9   :  { %1051 = vst [vmem:[#allocation8 + $0x138] sm:$0xff] %v751_v47  ;;  %v753_v48 = vpop.f32.mrb[27].mxu1 }
 0x2ba   :  { %1052 = vst [vmem:[#allocation8 + $0x140] sm:$0xff] %v753_v48 }
 0x2bc   :  { %v757_v49 = vpop.f32.mrb[28].mxu1 }
 0x2bd   :  { %1054 = vst [vmem:[#allocation8 + $0x150] sm:$0xff] %v757_v49  ;;  %v759_v50 = vpop.f32.mrb[29].mxu1 }
 0x2be   :  { %1055 = vst [vmem:[#allocation8 + $0x158] sm:$0xff] %v759_v50 }
 0x2c0   :  { %v763_v51 = vpop.f32.mrb[30].mxu1 }
 0x2c1   :  { %1057 = vst [vmem:[#allocation8 + $0x168] sm:$0xff] %v763_v51  ;;  %v765_v52 = vpop.f32.mrb[31].mxu1 }
 0x2c2   :  { %1058 = vst [vmem:[#allocation8 + $0x170] sm:$0xff] %v765_v52 }
 0x2c4   :  { %v769_v53 = vpop.f32.mrb[32].mxu1 }
 0x2c5   :  { %1060 = vst [vmem:[#allocation8 + $0x180] sm:$0xff] %v769_v53  ;;  %v771_v54 = vpop.f32.mrb[33].mxu1 }
 0x2c6   :  { %1061 = vst [vmem:[#allocation8 + $0x188] sm:$0xff] %v771_v54 }
 0x2c8   :  { %v775_v0 = vpop.f32.mrb[34].mxu1 }
 0x2c9   :  { %1063 = vst [vmem:[#allocation8 + $0x198] sm:$0xff] %v775_v0  ;;  %v777_v55 = vpop.f32.mrb[35].mxu1 }
 0x2ca   :  { %1064 = vst [vmem:[#allocation8 + $0x1a0] sm:$0xff] %v777_v55 }
 0x2cc   :  { %v781_v56 = vpop.f32.mrb[36].mxu1 }
 0x2cd   :  { %1066 = vst [vmem:[#allocation8 + $0x1b0] sm:$0xff] %v781_v56  ;;  %v783_v57 = vpop.f32.mrb[37].mxu1 }
 0x2ce   :  { %1067 = vst [vmem:[#allocation8 + $0x1b8] sm:$0xff] %v783_v57 }
 0x2d0   :  { %v787_v58 = vpop.f32.mrb[38].mxu1 }
 0x2d1   :  { %1069 = vst [vmem:[#allocation8 + $0x1c8] sm:$0xff] %v787_v58  ;;  %v789_v59 = vpop.f32.mrb[39].mxu1 }
 0x2d2   :  { %1070 = vst [vmem:[#allocation8 + $0x1d0] sm:$0xff] %v789_v59 }
 0x2d4   :  { %v793_v60 = vpop.f32.mrb[40].mxu1 }
 0x2d5   :  { %1072 = vst [vmem:[#allocation8 + $0x1e0] sm:$0xff] %v793_v60  ;;  %v795_v61 = vpop.f32.mrb[41].mxu1 }
 0x2d6   :  { %1073 = vst [vmem:[#allocation8 + $0x1e8] sm:$0xff] %v795_v61 }
 0x2d8   :  { %v799_v62 = vpop.f32.mrb[42].mxu1 }
 0x2d9   :  { %1075 = vst [vmem:[#allocation8 + $0x1f8] sm:$0xff] %v799_v62  ;;  %v801_v63 = vpop.f32.mrb[43].mxu1 }
 0x2da   :  { %1076 = vst [vmem:[#allocation8 + $0x200] sm:$0xff] %v801_v63 }
 0x2dc   :  { %v805_v1 = vpop.f32.mrb[44].mxu1 }
 0x2dd   :  { %1078 = vst [vmem:[#allocation8 + $0x210] sm:$0xff] %v805_v1  ;;  %v807_v2 = vpop.f32.mrb[45].mxu1 }
 0x2de   :  { %1079 = vst [vmem:[#allocation8 + $0x218] sm:$0xff] %v807_v2 }
 0x2e0   :  { %v811_v3 = vpop.f32.mrb[46].mxu1 }
 0x2e1   :  { %1081 = vst [vmem:[#allocation8 + $0x228] sm:$0xff] %v811_v3  ;;  %v813_v4 = vpop.f32.mrb[47].mxu1 }
 0x2e2   :  { %1082 = vst [vmem:[#allocation8 + $0x230] sm:$0xff] %v813_v4 }
 0x2e4   :  { %v817_v5 = vpop.f32.mrb[48].mxu1 }
 0x2e5   :  { %1084 = vst [vmem:[#allocation8 + $0x240] sm:$0xff] %v817_v5  ;;  %v819_v6 = vpop.f32.mrb[49].mxu1 }
 0x2e6   :  { %1085 = vst [vmem:[#allocation8 + $0x248] sm:$0xff] %v819_v6 }
 0x2e8   :  { %v888_v7 = vpop.f32.mrb[50].mxu1 }
 0x2e9   :  { %1014 = vst [vmem:[#allocation8 + $0x10] sm:$0xff] %v888_v7  ;;  %v1328_v8 = vpop.f32.mrb[51].mxu1 }
 0x2ec   :  { %v893_v9 = vpop.f32.mrb[52].mxu1 }
 0x2ed   :  { %1017 = vst [vmem:[#allocation8 + $0x28] sm:$0xff] %v893_v9  ;;  %v1331_v10 = vpop.f32.mrb[53].mxu1 }
 0x2f0   :  { %v898_v11 = vpop.f32.mrb[54].mxu1 }
 0x2f1   :  { %1020 = vst [vmem:[#allocation8 + $0x40] sm:$0xff] %v898_v11  ;;  %v1334_v12 = vpop.f32.mrb[55].mxu1 }
 0x2f4   :  { %v903_v13 = vpop.f32.mrb[56].mxu1 }
 0x2f5   :  { %1023 = vst [vmem:[#allocation8 + $0x58] sm:$0xff] %v903_v13  ;;  %v1337_v14 = vpop.f32.mrb[57].mxu1 }
 0x2f8   :  { %v908_v16 = vpop.f32.mrb[58].mxu1 }
 0x2f9   :  { %1026 = vst [vmem:[#allocation8 + $0x70] sm:$0xff] %v908_v16  ;;  %v1340_v17 = vpop.f32.mrb[59].mxu1 }
 0x2fc   :  { %v913_v18 = vpop.f32.mrb[60].mxu1 }
 0x2fd   :  { %1029 = vst [vmem:[#allocation8 + $0x88] sm:$0xff] %v913_v18  ;;  %v1343_v19 = vpop.f32.mrb[61].mxu1 }
 0x300   :  { %v918_v21 = vpop.f32.mrb[62].mxu1 }
 0x301   :  { %1032 = vst [vmem:[#allocation8 + $0xa0] sm:$0xff] %v918_v21  ;;  %v1346_v22 = vpop.f32.mrb[63].mxu1 }
 0x304   :  { %v923_v15 = vpop.f32.mrb[64].mxu1 }
 0x305   :  { %1035 = vst [vmem:[#allocation8 + $0xb8] sm:$0xff] %v923_v15  ;;  %v1349_v20 = vpop.f32.mrb[65].mxu1 }
 0x308   :  { %v928_v23 = vpop.f32.mrb[66].mxu1 }
 0x309   :  { %1038 = vst [vmem:[#allocation8 + $0xd0] sm:$0xff] %v928_v23  ;;  %v1352_v24 = vpop.f32.mrb[67].mxu1 }
 0x30c   :  { %v933_v25 = vpop.f32.mrb[68].mxu1 }
 0x30d   :  { %1041 = vst [vmem:[#allocation8 + $0xe8] sm:$0xff] %v933_v25  ;;  %v1355_v26 = vpop.f32.mrb[69].mxu1 }
 0x310   :  { %v938_v27 = vpop.f32.mrb[70].mxu1 }
 0x311   :  { %1044 = vst [vmem:[#allocation8 + $0x100] sm:$0xff] %v938_v27  ;;  %v1358_v28 = vpop.f32.mrb[71].mxu1 }
 0x314   :  { %v943_v29 = vpop.f32.mrb[72].mxu1 }
 0x315   :  { %1047 = vst [vmem:[#allocation8 + $0x118] sm:$0xff] %v943_v29  ;;  %v1361_v32 = vpop.f32.mrb[73].mxu1 }
 0x318   :  { %v948_v30 = vpop.f32.mrb[74].mxu1 }
 0x319   :  { %1050 = vst [vmem:[#allocation8 + $0x130] sm:$0xff] %v948_v30  ;;  %v1364_v31 = vpop.f32.mrb[75].mxu1 }
 0x31c   :  { %v953_v33 = vpop.f32.mrb[76].mxu1 }
 0x31d   :  { %1053 = vst [vmem:[#allocation8 + $0x148] sm:$0xff] %v953_v33  ;;  %v1367_v34 = vpop.f32.mrb[77].mxu1 }
 0x320   :  { %v958_v35 = vpop.f32.mrb[78].mxu1 }
 0x321   :  { %1056 = vst [vmem:[#allocation8 + $0x160] sm:$0xff] %v958_v35  ;;  %v1370_v36 = vpop.f32.mrb[79].mxu1 }
 0x324   :  { %v963_v37 = vpop.f32.mrb[80].mxu1 }
 0x325   :  { %1059 = vst [vmem:[#allocation8 + $0x178] sm:$0xff] %v963_v37  ;;  %v1373_v38 = vpop.f32.mrb[81].mxu1 }
 0x328   :  { %v968_v39 = vpop.f32.mrb[82].mxu1 }
 0x329   :  { %1062 = vst [vmem:[#allocation8 + $0x190] sm:$0xff] %v968_v39  ;;  %v1376_v40 = vpop.f32.mrb[83].mxu1 }
 0x32c   :  { %v973_v41 = vpop.f32.mrb[84].mxu1 }
 0x32d   :  { %1065 = vst [vmem:[#allocation8 + $0x1a8] sm:$0xff] %v973_v41  ;;  %v1379_v42 = vpop.f32.mrb[85].mxu1 }
 0x330   :  { %v978_v43 = vpop.f32.mrb[86].mxu1 }
 0x331   :  { %1068 = vst [vmem:[#allocation8 + $0x1c0] sm:$0xff] %v978_v43  ;;  %v1382_v44 = vpop.f32.mrb[87].mxu1 }
 0x334   :  { %v983_v45 = vpop.f32.mrb[88].mxu1 }
 0x335   :  { %1071 = vst [vmem:[#allocation8 + $0x1d8] sm:$0xff] %v983_v45  ;;  %v1385_v46 = vpop.f32.mrb[89].mxu1 }
 0x338   :  { %v988_v47 = vpop.f32.mrb[90].mxu1 }
 0x339   :  { %1074 = vst [vmem:[#allocation8 + $0x1f0] sm:$0xff] %v988_v47  ;;  %v1388_v48 = vpop.f32.mrb[91].mxu1 }
 0x33c   :  { %v993_v49 = vpop.f32.mrb[92].mxu1 }
 0x33d   :  { %1077 = vst [vmem:[#allocation8 + $0x208] sm:$0xff] %v993_v49  ;;  %v1391_v50 = vpop.f32.mrb[93].mxu1 }
 0x340   :  { %v998_v51 = vpop.f32.mrb[94].mxu1 }
 0x341   :  { %1080 = vst [vmem:[#allocation8 + $0x220] sm:$0xff] %v998_v51  ;;  %v1394_v52 = vpop.f32.mrb[95].mxu1 }
 0x344   :  { %v1003_v53 = vpop.f32.mrb[96].mxu1 }
 0x345   :  { %1083 = vst [vmem:[#allocation8 + $0x238] sm:$0xff] %v1003_v53  ;;  %v1397_v54 = vpop.f32.mrb[97].mxu1 }
 0x348   :  { %v1008_v0 = vpop.f32.mrb[98].mxu1 }
 0x349   :  { %1086 = vst [vmem:[#allocation8 + $0x250] sm:$0xff] %v1008_v0  ;;  %v1400_v55 = vpop.f32.mrb[99].mxu1 }
 0x34a   :  { %1667 = shalt.err (!%p1664_p0)
}
 0x34b   :  { %s1668_s27 = scalar_lea.hbm %s2008_s3, 9600 }
 0x34c   :  { %p1669_p1 = scmp.ne.s32.totalorder %s2008_s3, %s1668_s27  ;;  %p1672_p2 = scmp.lt.u32.totalorder %s1668_s27, %s2008_s3 }
 0x34e   :  { %p1674_p3 = pnand %p1672_p2, %p1669_p1 }
 0x350   :  { %1677 = shalt.err (!%p1674_p3)
}
 0x351   :  { %1098 = dma.vmem_to_hbm [thread:$0]  %s1093_s23, 9600, %s2008_s3, [#allocation4], %s1688_s1, %s1688_s1, %s1689_s9  }
 0x352   :  { %1682 = dma.done.wait [#allocation4], 9600  }
 0x353   :  { %1683 = vsyncadd [#allocation4], 4294957696 }
 0x354   :  { %1102 = vsyncpa [#allocation3], 1 }
 0x355   :  { %1103 = vsyncpa [#allocation6], 1 }
 0x356   :  { %1104 = vsyncpa [#allocation4], 1 }

</bundles_post_ra>
